<compile_context>
chip_gen: v5e
topology: v5e:2x2
jax: 0.10.0
libtpu: 0.0.40
codegen_flags: <defaults>
</compile_context>

<pallas_src>
import functools

import jax
import jax.numpy as jnp
from jax.experimental import pallas as pl
from jax.experimental.pallas import tpu as pltpu


def _swish(x):
    return x * jax.nn.sigmoid(x)


def _round_up(n, m):
    return ((n + m - 1) // m) * m


def node2prop1_kernel(batch_ref, x_ref, w1_ref, b1_ref, w2_ref, b2_ref,
                      w3_ref, b3_ref, w4_ref, out_ref, agg_ref):
    i = pl.program_id(0)

    @pl.when(i == 0)
    def _():
        agg_ref[...] = jnp.zeros_like(agg_ref)

    # --- node_transform on this node tile: Dense -> swish -> Dense (bf16 MXU,
    #     f32 accumulation, f32 bias/activation math) -------------------------
    x = x_ref[...].astype(jnp.bfloat16)                                # (T, in)
    h = jnp.dot(x, w1_ref[...], preferred_element_type=jnp.float32) + b1_ref[...]
    h = _swish(h)                                                      # f32
    h = jnp.dot(h.astype(jnp.bfloat16), w2_ref[...],
                preferred_element_type=jnp.float32) + b2_ref[...]      # (T, H) f32

    # --- scatter(add) for this tile: (B_pad, T) bf16 one-hot segment matmul ---
    n_batch_pad = agg_ref.shape[0]
    tile_n = x_ref.shape[0]
    seg = batch_ref[...]                                               # (1, T) i32
    row_ids = jax.lax.broadcasted_iota(jnp.int32, (n_batch_pad, tile_n), 0)
    one_hot = (row_ids == seg).astype(jnp.bfloat16)                    # (B_pad, T)
    agg_ref[...] += jnp.dot(one_hot, h.astype(jnp.bfloat16),
                            preferred_element_type=jnp.float32)        # (B_pad, H)

    # --- output head only on the final node tile ------------------------------
    @pl.when(i == pl.num_programs(0) - 1)
    def _():
        agg = agg_ref[...]
        o = jnp.dot(agg.astype(jnp.bfloat16), w3_ref[...],
                    preferred_element_type=jnp.float32) + b3_ref[...]
        o = _swish(o)                                                  # f32
        out_ref[...] = jnp.dot(o.astype(jnp.bfloat16), w4_ref[...],
                               preferred_element_type=jnp.float32)     # lane-dense


def node2prop1(x, batch, n_batch, params, *, tile_n=256):
    """x: (n_node, in_dim) f32, batch: (n_node,) int32 graph ids, params: dict.

    Weights are stored (fan_in, fan_out) so Dense is y = x @ W + b.
    Returns (n_batch, out_dim) f32.
    """
    n_node, in_dim = x.shape
    hidden = params["w1"].shape[1]
    out_dim = params["w4"].shape[1]

    # --- padded / tiled geometry (lane/sublane legal for every BlockSpec) -----
    # Multi-tile: TILE_N must be a multiple of 128 so the (1, TILE_N) int32
    # batch-id block is lane-legal.  Single tile: use the full (8-padded) node
    # extent so block dims equal array dims.
    tile_n = max(128, _round_up(tile_n, 128))
    if n_node <= tile_n:
        tile_n = max(8, _round_up(n_node, 8))
    n_pad = _round_up(n_node, tile_n)
    n_tiles = n_pad // tile_n
    b_pad = max(8, _round_up(n_batch, 8))          # sublane-aligned accumulator
    out_pad = _round_up(out_dim, 128)              # lane-dense output slab

    # --- host-side padding / dtype prep --------------------------------------
    x_p = jnp.pad(x.astype(jnp.float32), ((0, n_pad - n_node), (0, 0)))
    # padded nodes get segment id -1 -> matched by no one-hot row.
    batch_p = jnp.pad(batch.astype(jnp.int32), (0, n_pad - n_node),
                      constant_values=-1).reshape(1, n_pad)

    bf = jnp.bfloat16
    w1 = params["w1"].astype(bf)
    w2 = params["w2"].astype(bf)
    w3 = params["w3"].astype(bf)
    w4 = jnp.pad(params["w4"], ((0, 0), (0, out_pad - out_dim))).astype(bf)
    b1 = params["b1"].reshape(1, hidden).astype(jnp.float32)
    b2 = params["b2"].reshape(1, hidden).astype(jnp.float32)
    b3 = params["b3"].reshape(1, hidden).astype(jnp.float32)

    resident = lambda shape: pl.BlockSpec(shape, lambda i: (0,) * len(shape))

    cost = pl.CostEstimate(
        flops=int(2 * n_pad * in_dim * hidden + 2 * n_pad * hidden * hidden
                  + 2 * b_pad * n_pad * hidden + 2 * b_pad * hidden * hidden
                  + 2 * b_pad * hidden * out_pad),
        transcendentals=int(n_pad * hidden + b_pad * hidden),
        bytes_accessed=int(x_p.size * 4 + batch_p.size * 4
                           + (w1.size + w2.size + w3.size + w4.size) * 2
                           + (b1.size + b2.size + b3.size) * 4
                           + b_pad * out_pad * 4),
    )

    out_padded = pl.pallas_call(
        node2prop1_kernel,
        out_shape=jax.ShapeDtypeStruct((b_pad, out_pad), jnp.float32),
        grid_spec=pltpu.PrefetchScalarGridSpec(
            num_scalar_prefetch=0,
            grid=(n_tiles,),
            in_specs=[
                pl.BlockSpec((1, tile_n), lambda i: (0, i)),       # batch ids
                pl.BlockSpec((tile_n, in_dim), lambda i: (i, 0)),  # x tile
                resident((in_dim, hidden)),                        # w1 (bf16)
                resident((1, hidden)),                             # b1
                resident((hidden, hidden)),                        # w2 (bf16)
                resident((1, hidden)),                             # b2
                resident((hidden, hidden)),                        # w3 (bf16)
                resident((1, hidden)),                             # b3
                resident((hidden, out_pad)),                       # w4 (bf16, padded)
            ],
            out_specs=resident((b_pad, out_pad)),
            scratch_shapes=[pltpu.VMEM((b_pad, hidden), jnp.float32)],
        ),
        compiler_params=pltpu.CompilerParams(
            dimension_semantics=("arbitrary",),   # node axis carries the reduction
            vmem_limit_bytes=64 << 20,
        ),
        cost_estimate=cost,
    )(batch_p, x_p, w1, b1, w2, b2, w3, b3, w4)

    return out_padded[:n_batch, :out_dim]


# ------------------------------- references ----------------------------------

def _reference_f32(x, batch, n_batch, params):
    h = _swish(x @ params["w1"] + params["b1"])
    h = h @ params["w2"] + params["b2"]
    agg = jax.ops.segment_sum(h, batch, num_segments=n_batch)
    o = _swish(agg @ params["w3"] + params["b3"])
    return o @ params["w4"]


def _reference_bf16(x, batch, n_batch, params):
    """Same numerics as the kernel: bf16 matmul operands, f32 accumulation."""
    bf = jnp.bfloat16
    dot = functools.partial(jnp.dot, preferred_element_type=jnp.float32)
    h = _swish(dot(x.astype(bf), params["w1"].astype(bf)) + params["b1"])
    h = dot(h.astype(bf), params["w2"].astype(bf)) + params["b2"]
    agg = jax.ops.segment_sum(h.astype(bf).astype(jnp.float32), batch,
                              num_segments=n_batch)
    o = _swish(dot(agg.astype(bf), params["w3"].astype(bf)) + params["b3"])
    return dot(o.astype(bf), params["w4"].astype(bf))


if __name__ == "__main__":
    # Small, module-consistent shapes (EGNN defaults: hidden=128, out_dim=1).
    n_node, in_dim, hidden, out_dim, n_batch = 16, 32, 128, 1, 2

    key = jax.random.PRNGKey(0)
    ks = jax.random.split(key, 9)
    scale = lambda fan_in: 1.0 / jnp.sqrt(jnp.float32(fan_in))

    params = {
        "w1": jax.random.normal(ks[0], (in_dim, hidden), jnp.float32) * scale(in_dim),
        "b1": jax.random.normal(ks[1], (1, hidden), jnp.float32) * 0.1,
        "w2": jax.random.normal(ks[2], (hidden, hidden), jnp.float32) * scale(hidden),
        "b2": jax.random.normal(ks[3], (1, hidden), jnp.float32) * 0.1,
        "w3": jax.random.normal(ks[4], (hidden, hidden), jnp.float32) * scale(hidden),
        "b3": jax.random.normal(ks[5], (1, hidden), jnp.float32) * 0.1,
        "w4": jax.random.normal(ks[6], (hidden, out_dim), jnp.float32) * scale(hidden),
    }

    x = jax.random.normal(ks[7], (n_node, in_dim), jnp.float32)
    # Node -> graph assignment (sorted, as produced by PyG batching).
    batch = jnp.concatenate([
        jnp.zeros((n_node // 2,), jnp.int32),
        jnp.ones((n_node - n_node // 2,), jnp.int32),
    ])

    out = node2prop1(x, batch, n_batch, params)
    out = jax.block_until_ready(out)
    assert out.shape == (n_batch, out_dim)

    # Tight check vs a reference with the kernel's exact numerics (bf16 matmul
    # operands, f32 accumulation), loose check vs the all-f32 reference.
    ref_bf16 = _reference_bf16(x, batch, n_batch, params)
    ref_f32 = _reference_f32(x, batch, n_batch, params)
    assert jnp.allclose(out, ref_bf16, atol=1e-3, rtol=1e-3), (out, ref_bf16)
    assert jnp.allclose(out, ref_f32, atol=7e-2, rtol=7e-2), (out, ref_f32)

    # Exercise the multi-tile (grid > 1) path as well: 300 nodes, 3 graphs.
    n_node2, n_batch2 = 300, 3
    x2 = jax.random.normal(ks[8], (n_node2, in_dim), jnp.float32)
    batch2 = jnp.sort(jax.random.randint(key, (n_node2,), 0, n_batch2)).astype(jnp.int32)
    out2 = jax.block_until_ready(node2prop1(x2, batch2, n_batch2, params, tile_n=128))
    ref2 = _reference_f32(x2, batch2, n_batch2, params)
    assert out2.shape == (n_batch2, out_dim)
    assert jnp.allclose(out2, ref2, atol=2e-1, rtol=2e-1), (out2, ref2)

    print("KERNEL_OK")
</pallas_src>

<mosaic_0001>
module attributes {stable_mosaic.version = 11 : i64} {
  func.func @node2prop1_kernel(%arg0: i32, %arg1: memref<1x16xi32, #tpu.memory_space<vmem>>, %arg2: memref<16x32xf32, #tpu.memory_space<vmem>>, %arg3: memref<32x128xbf16, #tpu.memory_space<vmem>>, %arg4: memref<1x128xf32, #tpu.memory_space<vmem>>, %arg5: memref<128x128xbf16, #tpu.memory_space<vmem>>, %arg6: memref<1x128xf32, #tpu.memory_space<vmem>>, %arg7: memref<128x128xbf16, #tpu.memory_space<vmem>>, %arg8: memref<1x128xf32, #tpu.memory_space<vmem>>, %arg9: memref<128x128xbf16, #tpu.memory_space<vmem>>, %arg10: memref<8x128xf32, #tpu.memory_space<vmem>>, %arg11: memref<8x128xf32, #tpu.memory_space<vmem>>) attributes {dimension_semantics = [#tpu.dimension_semantics<arbitrary>], iteration_bounds = array<i64: 1>, scalar_prefetch = 0 : i64, scratch_operands = 1 : i64, tpu.core_type = #tpu.core_type<tc>, window_params = [{transform_indices = @transform_0, window_bounds = array<i64: 1, 16>}, {transform_indices = @transform_1, window_bounds = array<i64: 16, 32>}, {pipeline_mode = #tpu.pipeline_mode<synchronous>, transform_indices = @transform_2, window_bounds = array<i64: 32, 128>}, {pipeline_mode = #tpu.pipeline_mode<synchronous>, transform_indices = @transform_3, window_bounds = array<i64: 1, 128>}, {pipeline_mode = #tpu.pipeline_mode<synchronous>, transform_indices = @transform_4, window_bounds = array<i64: 128, 128>}, {pipeline_mode = #tpu.pipeline_mode<synchronous>, transform_indices = @transform_5, window_bounds = array<i64: 1, 128>}, {pipeline_mode = #tpu.pipeline_mode<synchronous>, transform_indices = @transform_6, window_bounds = array<i64: 128, 128>}, {pipeline_mode = #tpu.pipeline_mode<synchronous>, transform_indices = @transform_7, window_bounds = array<i64: 1, 128>}, {pipeline_mode = #tpu.pipeline_mode<synchronous>, transform_indices = @transform_8, window_bounds = array<i64: 128, 128>}, {pipeline_mode = #tpu.pipeline_mode<synchronous>, transform_indices = @transform_9, window_bounds = array<i64: 8, 128>}]} {
    %c0_i32 = arith.constant 0 : i32
    %0 = arith.cmpi eq, %arg0, %c0_i32 : i32
    %1 = arith.extui %0 : i1 to i32
    %c0_i32_0 = arith.constant 0 : i32
    %2 = arith.cmpi ne, %1, %c0_i32_0 : i32
    scf.if %2 {
      %cst_21 = arith.constant 0.000000e+00 : f32
      %37 = vector.broadcast %cst_21 : f32 to vector<8x128xf32>
      %c0_22 = arith.constant 0 : index
      %c0_23 = arith.constant 0 : index
      %38 = vector.load %arg11[%c0_22, %c0_23] : memref<8x128xf32, #tpu.memory_space<vmem>>, vector<8x128xf32>
      tpu.vector_store %arg11[%c0_22, %c0_23], %37 {strides = array<i32>} : memref<8x128xf32, #tpu.memory_space<vmem>>, vector<8x128xf32>,
    } else {
    }
    %c0 = arith.constant 0 : index
    %c0_1 = arith.constant 0 : index
    %3 = vector.load %arg2[%c0, %c0_1] : memref<16x32xf32, #tpu.memory_space<vmem>>, vector<16x32xf32>
    %4 = arith.truncf %3 : vector<16x32xf32> to vector<16x32xbf16>
    %c0_2 = arith.constant 0 : index
    %c0_3 = arith.constant 0 : index
    %5 = vector.load %arg3[%c0_2, %c0_3] : memref<32x128xbf16, #tpu.memory_space<vmem>>, vector<32x128xbf16>
    %cst = arith.constant dense<0.000000e+00> : vector<16x128xf32>
    %6 = tpu.matmul %4, %5, %cst {dimension_numbers = #tpu.dot_dimension_numbers<[1], [0], [0], [1], [0, 0, 1, 1], [], []>} : vector<16x32xbf16>, vector<32x128xbf16>, vector<16x128xf32> -> vector<16x128xf32>
    %c0_4 = arith.constant 0 : index
    %c0_5 = arith.constant 0 : index
    %7 = vector.load %arg4[%c0_4, %c0_5] : memref<1x128xf32, #tpu.memory_space<vmem>>, vector<1x128xf32>
    %8 = vector.broadcast %7 : vector<1x128xf32> to vector<16x128xf32>
    %9 = arith.addf %6, %8 : vector<16x128xf32>
    %10 = arith.negf %9 : vector<16x128xf32>
    %11 = math.exp %10 : vector<16x128xf32>
    %cst_6 = arith.constant 1.000000e+00 : f32
    %12 = vector.broadcast %cst_6 : f32 to vector<16x128xf32>
    %13 = arith.addf %12, %11 : vector<16x128xf32>
    %14 = arith.divf %12, %13 : vector<16x128xf32>
    %15 = arith.mulf %9, %14 : vector<16x128xf32>
    %16 = arith.truncf %15 : vector<16x128xf32> to vector<16x128xbf16>
    %c0_7 = arith.constant 0 : index
    %c0_8 = arith.constant 0 : index
    %17 = vector.load %arg5[%c0_7, %c0_8] : memref<128x128xbf16, #tpu.memory_space<vmem>>, vector<128x128xbf16>
    %cst_9 = arith.constant dense<0.000000e+00> : vector<16x128xf32>
    %18 = tpu.matmul %16, %17, %cst_9 {dimension_numbers = #tpu.dot_dimension_numbers<[1], [0], [0], [1], [0, 0, 1, 1], [], []>} : vector<16x128xbf16>, vector<128x128xbf16>, vector<16x128xf32> -> vector<16x128xf32>
    %c0_10 = arith.constant 0 : index
    %c0_11 = arith.constant 0 : index
    %19 = vector.load %arg6[%c0_10, %c0_11] : memref<1x128xf32, #tpu.memory_space<vmem>>, vector<1x128xf32>
    %20 = vector.broadcast %19 : vector<1x128xf32> to vector<16x128xf32>
    %21 = arith.addf %18, %20 : vector<16x128xf32>
    %c0_12 = arith.constant 0 : index
    %c0_13 = arith.constant 0 : index
    %22 = vector.load %arg1[%c0_12, %c0_13] : memref<1x16xi32, #tpu.memory_space<vmem>>, vector<1x16xi32>
    %23 = tpu.iota {dimensions = array<i32: 0>} : vector<8x16xi32>
    %24 = vector.broadcast %22 : vector<1x16xi32> to vector<8x16xi32>
    %25 = arith.cmpi eq, %23, %24 : vector<8x16xi32>
    %26 = arith.extui %25 : vector<8x16xi1> to vector<8x16xi32>
    %27 = arith.sitofp %26 : vector<8x16xi32> to vector<8x16xf32>
    %28 = arith.truncf %27 : vector<8x16xf32> to vector<8x16xbf16>
    %c0_14 = arith.constant 0 : index
    %c0_15 = arith.constant 0 : index
    %29 = vector.load %arg11[%c0_14, %c0_15] : memref<8x128xf32, #tpu.memory_space<vmem>>, vector<8x128xf32>
    %30 = arith.truncf %21 : vector<16x128xf32> to vector<16x128xbf16>
    %cst_16 = arith.constant dense<0.000000e+00> : vector<8x128xf32>
    %31 = tpu.matmul %28, %30, %cst_16 {dimension_numbers = #tpu.dot_dimension_numbers<[1], [0], [0], [1], [0, 0, 1, 1], [], []>} : vector<8x16xbf16>, vector<16x128xbf16>, vector<8x128xf32> -> vector<8x128xf32>
    %32 = arith.addf %29, %31 : vector<8x128xf32>
    %c0_17 = arith.constant 0 : index
    %c0_18 = arith.constant 0 : index
    %33 = vector.load %arg11[%c0_17, %c0_18] : memref<8x128xf32, #tpu.memory_space<vmem>>, vector<8x128xf32>
    tpu.vector_store %arg11[%c0_17, %c0_18], %32 {strides = array<i32>} : memref<8x128xf32, #tpu.memory_space<vmem>>, vector<8x128xf32>,
    %c0_i32_19 = arith.constant 0 : i32
    %34 = arith.cmpi eq, %arg0, %c0_i32_19 : i32
    %35 = arith.extui %34 : i1 to i32
    %c0_i32_20 = arith.constant 0 : i32
    %36 = arith.cmpi ne, %35, %c0_i32_20 : i32
    scf.if %36 {
      %c0_21 = arith.constant 0 : index
      %c0_22 = arith.constant 0 : index
      %37 = vector.load %arg11[%c0_21, %c0_22] : memref<8x128xf32, #tpu.memory_space<vmem>>, vector<8x128xf32>
      %38 = arith.truncf %37 : vector<8x128xf32> to vector<8x128xbf16>
      %c0_23 = arith.constant 0 : index
      %c0_24 = arith.constant 0 : index
      %39 = vector.load %arg7[%c0_23, %c0_24] : memref<128x128xbf16, #tpu.memory_space<vmem>>, vector<128x128xbf16>
      %cst_25 = arith.constant dense<0.000000e+00> : vector<8x128xf32>
      %40 = tpu.matmul %38, %39, %cst_25 {dimension_numbers = #tpu.dot_dimension_numbers<[1], [0], [0], [1], [0, 0, 1, 1], [], []>} : vector<8x128xbf16>, vector<128x128xbf16>, vector<8x128xf32> -> vector<8x128xf32>
      %c0_26 = arith.constant 0 : index
      %c0_27 = arith.constant 0 : index
      %41 = vector.load %arg8[%c0_26, %c0_27] : memref<1x128xf32, #tpu.memory_space<vmem>>, vector<1x128xf32>
      %42 = vector.broadcast %41 : vector<1x128xf32> to vector<8x128xf32>
      %43 = arith.addf %40, %42 : vector<8x128xf32>
      %44 = arith.negf %43 : vector<8x128xf32>
      %45 = math.exp %44 : vector<8x128xf32>
      %cst_28 = arith.constant 1.000000e+00 : f32
      %46 = vector.broadcast %cst_28 : f32 to vector<8x128xf32>
      %47 = arith.addf %46, %45 : vector<8x128xf32>
      %48 = arith.divf %46, %47 : vector<8x128xf32>
      %49 = arith.mulf %43, %48 : vector<8x128xf32>
      %50 = arith.truncf %49 : vector<8x128xf32> to vector<8x128xbf16>
      %c0_29 = arith.constant 0 : index
      %c0_30 = arith.constant 0 : index
      %51 = vector.load %arg9[%c0_29, %c0_30] : memref<128x128xbf16, #tpu.memory_space<vmem>>, vector<128x128xbf16>
      %cst_31 = arith.constant dense<0.000000e+00> : vector<8x128xf32>
      %52 = tpu.matmul %50, %51, %cst_31 {dimension_numbers = #tpu.dot_dimension_numbers<[1], [0], [0], [1], [0, 0, 1, 1], [], []>} : vector<8x128xbf16>, vector<128x128xbf16>, vector<8x128xf32> -> vector<8x128xf32>
      %c0_32 = arith.constant 0 : index
      %c0_33 = arith.constant 0 : index
      %53 = vector.load %arg10[%c0_32, %c0_33] : memref<8x128xf32, #tpu.memory_space<vmem>>, vector<8x128xf32>
      tpu.vector_store %arg10[%c0_32, %c0_33], %52 {strides = array<i32>} : memref<8x128xf32, #tpu.memory_space<vmem>>, vector<8x128xf32>,
    } else {
    }
    return
  }
  func.func @transform_0(%arg0: i32) -> (i32, i32) {
    %c0_i32 = arith.constant 0 : i32
    %c0_i32_0 = arith.constant 0 : i32
    return %c0_i32, %arg0 : i32, i32
  }
  func.func @transform_1(%arg0: i32) -> (i32, i32) {
    %c0_i32 = arith.constant 0 : i32
    %c0_i32_0 = arith.constant 0 : i32
    return %arg0, %c0_i32 : i32, i32
  }
  func.func @transform_2(%arg0: i32) -> (i32, i32) {
    %c0_i32 = arith.constant 0 : i32
    %c0_i32_0 = arith.constant 0 : i32
    %c0_i32_1 = arith.constant 0 : i32
    return %c0_i32, %c0_i32_0 : i32, i32
  }
  func.func @transform_3(%arg0: i32) -> (i32, i32) {
    %c0_i32 = arith.constant 0 : i32
    %c0_i32_0 = arith.constant 0 : i32
    %c0_i32_1 = arith.constant 0 : i32
    return %c0_i32, %c0_i32_0 : i32, i32
  }
  func.func @transform_4(%arg0: i32) -> (i32, i32) {
    %c0_i32 = arith.constant 0 : i32
    %c0_i32_0 = arith.constant 0 : i32
    %c0_i32_1 = arith.constant 0 : i32
    return %c0_i32, %c0_i32_0 : i32, i32
  }
  func.func @transform_5(%arg0: i32) -> (i32, i32) {
    %c0_i32 = arith.constant 0 : i32
    %c0_i32_0 = arith.constant 0 : i32
    %c0_i32_1 = arith.constant 0 : i32
    return %c0_i32, %c0_i32_0 : i32, i32
  }
  func.func @transform_6(%arg0: i32) -> (i32, i32) {
    %c0_i32 = arith.constant 0 : i32
    %c0_i32_0 = arith.constant 0 : i32
    %c0_i32_1 = arith.constant 0 : i32
    return %c0_i32, %c0_i32_0 : i32, i32
  }
  func.func @transform_7(%arg0: i32) -> (i32, i32) {
    %c0_i32 = arith.constant 0 : i32
    %c0_i32_0 = arith.constant 0 : i32
    %c0_i32_1 = arith.constant 0 : i32
    return %c0_i32, %c0_i32_0 : i32, i32
  }
  func.func @transform_8(%arg0: i32) -> (i32, i32) {
    %c0_i32 = arith.constant 0 : i32
    %c0_i32_0 = arith.constant 0 : i32
    %c0_i32_1 = arith.constant 0 : i32
    return %c0_i32, %c0_i32_0 : i32, i32
  }
  func.func @transform_9(%arg0: i32) -> (i32, i32) {
    %c0_i32 = arith.constant 0 : i32
    %c0_i32_0 = arith.constant 0 : i32
    %c0_i32_1 = arith.constant 0 : i32
    return %c0_i32, %c0_i32_0 : i32, i32
  }
}

</mosaic_0001>

<bundles_post_ra>
// kernel: tpu_custom_call.1
= control target key start
LH: loop header
LB: loop body
LE: loop exit
PB: predicated region body
PF: predicated region fallthrough
CT: control target
= control target key end

     0   :  { %14 = vsyncpa [#allocation4], 0  ;;  %s963_s0 = inlined_call_operand.hbm [shape: s32[1,16], index: 0, kind: input, shape index: {}]   ;;  %s964_s1 = inlined_call_operand.hbm [shape: f32[16,32], index: 1, kind: input, shape index: {}]   ;;  %s965_s2 = inlined_call_operand.hbm [shape: bf16[32,128], index: 2, kind: input, shape index: {}]   ;;  %s966_s3 = inlined_call_operand.vmem [shape: f32[1,128], index: 3, kind: input, shape index: {}]   ;;  %s967_s4 = inlined_call_operand.hbm [shape: bf16[128,128], index: 4, kind: input, shape index: {}]   ;;  %s968_s5 = inlined_call_operand.vmem [shape: f32[1,128], index: 5, kind: input, shape index: {}]   ;;  %s969_s6 = inlined_call_operand.hbm [shape: bf16[128,128], index: 6, kind: input, shape index: {}]   ;;  %s970_s7 = inlined_call_operand.vmem [shape: f32[1,128], index: 7, kind: input, shape index: {}]   ;;  %s971_s8 = inlined_call_operand.hbm [shape: bf16[128,128], index: 8, kind: input, shape index: {}]   ;;  %s972_s9 = inlined_call_operand.hbm [shape: f32[8,128], index: 9, kind: output, shape index: {}]  }
   0x1   :  { %15 = vsyncpa [#allocation7], 0 }
   0x2   :  { %16 = vsyncpa [#allocation10], 0 }
   0x3   :  { %17 = vsyncpa [#allocation13], 0  ;;  %s34_s11 = sshll.u32 %s964_s1, 4  ;;  %s35_s11 = int_to_ptr.hbm [resolvable:$true] %s34_s11 }
   0x4   :  { %18 = vsyncpa [#allocation5], 0  ;;  %s871_s12 = smov [#allocation6]   ;;  %s872_s14 = smov 128  }
   0x5   :  { %s36_s13 = sshll.u32 %s871_s12, 4  ;;  %s873_s15 = smov 8   ;;  %s37_s13 = int_to_ptr.vmem [resolvable:$true] %s36_s13 }
   0x6   :  { %42 = dma.hbm_to_vmem [thread:$0]  %s35_s11, 256, %s37_s13, [#allocation7], %s872_s14, %s872_s14, %s873_s15  }
   0x7   :  { %s62_s18 = sshll.u32 %s967_s4, 4  ;;  %s874_s19 = smov [#allocation9]   ;;  %s63_s18 = int_to_ptr.hbm [resolvable:$true] %s62_s18 }
   0x8   :  { %s64_s20 = sshll.u32 %s874_s19, 4  ;;  %s24_s23 = sshll.u32 %s963_s0, 4  ;;  %s65_s20 = int_to_ptr.vmem [resolvable:$true] %s64_s20  ;;  %s25_s23 = int_to_ptr.hbm [resolvable:$true] %s24_s23 }
   0x9   :  { %s875_s1 = smov 64   ;;  %s876_s24 = smov 4  }
   0xa   :  { %70 = dma.hbm_to_vmem [thread:$0]  %s63_s18, 1024, %s65_s20, [#allocation10], %s875_s1, %s875_s1, %s876_s24  }
   0xb   :  { %s47_s27 = sshll.u32 %s965_s2, 4  ;;  %s877_s28 = smov [#allocation3]   ;;  %s48_s27 = int_to_ptr.hbm [resolvable:$true] %s47_s27 }
   0xc   :  { %s26_s29 = sshll.u32 %s877_s28, 4  ;;  %s878_s4 = smov [#allocation8]   ;;  %s27_s29 = int_to_ptr.vmem [resolvable:$true] %s26_s29 }
   0xd   :  { %29 = dma.hbm_to_vmem [thread:$0]  %s25_s23, 16, %s27_s29, [#allocation4]  }
   0xe   :  { %s49_s30 = sshll.u32 %s878_s4, 4  ;;  %s77_s0 = sshll.u32 %s969_s6, 4  ;;  %s50_s30 = int_to_ptr.vmem [resolvable:$true] %s49_s30  ;;  %s78_s0 = int_to_ptr.hbm [resolvable:$true] %s77_s0 }
   0xf   :  { %55 = dma.hbm_to_vmem [thread:$0]  %s48_s27, 256, %s50_s30, [#allocation7], %s875_s1, %s875_s1, %s876_s24  }
  0x10   :  { %s92_s14 = sshll.u32 %s971_s8, 4  ;;  %s879_s15 = smov [#allocation11]   ;;  %s93_s14 = int_to_ptr.hbm [resolvable:$true] %s92_s14 }
  0x11   :  { %s79_s2 = sshll.u32 %s879_s15, 4  ;;  %s880_s16 = smov [#allocation12]   ;;  %s80_s2 = int_to_ptr.vmem [resolvable:$true] %s79_s2 }
  0x12   :  { %85 = dma.hbm_to_vmem [thread:$0]  %s78_s0, 1024, %s80_s2, [#allocation10], %s875_s1, %s875_s1, %s876_s24  }
  0x13   :  { %s94_s17 = sshll.u32 %s880_s16, 4  ;;  %s95_s17 = int_to_ptr.vmem [resolvable:$true] %s94_s17 }
  0x14   :  { %100 = dma.hbm_to_vmem [thread:$0]  %s93_s14, 1024, %s95_s17, [#allocation13], %s875_s1, %s875_s1, %s876_s24  }
  0x15   :  { %861 = dma.done.wait [#allocation4], 16  }
  0x16   :  { %862 = vsyncadd [#allocation4], 4294967280 }
  0x17   :  { %863 = dma.done.wait [#allocation7], 512  }
  0x18   :  { %864 = vsyncadd [#allocation7], 4294966784 }
  0x19   :  { %865 = dma.done.wait [#allocation10], 2048  }
  0x1a   :  { %866 = vsyncadd [#allocation10], 4294965248 }
  0x1b   :  { %867 = dma.done.wait [#allocation13], 1024  }
  0x1c   :  { %868 = vsyncadd [#allocation13], 4294966272  ;;  %v640_v0 = vld [vmem:[#allocation8 + $0x8] sm:$0xff]  ;;  %v639_v1 = vld [vmem:[#allocation8] sm:$0xff]  ;;  %vm154_vm0 = vcmask 261120   ;;  %v296_v51 = vlaneseq  ;;  %v881_v62 = vmov 0.0  }
  0x1d   :  { %v131_v2 = vld [vmem:[#allocation6] sm:$0xff]  ;;  %v132_v3 = vld [vmem:[#allocation6 + $0x8] sm:$0xff]  ;;  %164 = vmatpush.bf16.msra.mxu0 %v640_v0  ;;  %v648_v5 = vld [vmem:[#allocation9 + $0x38] sm:$0xff]  ;;  %vm305_vm10 = vcmask 130048   ;;  %s516_s23 = sshll.u32 %s972_s9, 4  ;;  %s517_s23 = int_to_ptr.hbm [resolvable:$true] %s516_s23 }
  0x1e   :  { %v133_v4 = vpack.c.bf16 %v132_v3, %v131_v2  ;;  %281 = vmatpush.bf16.msra.mxu1 %v648_v5  ;;  %v647_v6 = vld [vmem:[#allocation9 + $0x30] sm:$0xff]  ;;  %v646_v7 = vld [vmem:[#allocation9 + $0x28] sm:$0xff]  ;;  %v645_v8 = vld [vmem:[#allocation9 + $0x20] sm:$0xff]  ;;  %v297_v54 = vshrl.u32 %v296_v51, 7 }
  0x1f   :  { %v644_v9 = vld [vmem:[#allocation9 + $0x18] sm:$0xff]  ;;  %v643_v11 = vld [vmem:[#allocation9 + $0x10] sm:$0xff]  ;;  %v642_v14 = vld [vmem:[#allocation9 + $0x8] sm:$0xff] }
  0x20   :  { %v677_v10 = vld [vmem:[%s966_s3] ss:$0 sm:$0xff]  ;;  %v641_v16 = vld [vmem:[#allocation9] sm:$0xff]  ;;  %v655_v48 = vld [vmem:[#allocation11 + $0x30] sm:$0xff] }
  0x21   :  { %165 = vmatpush.bf16.msra.mxu0 %v639_v1  ;;  %v656_v47 = vld [vmem:[#allocation11 + $0x38] sm:$0xff]  ;;  %v654_v49 = vld [vmem:[#allocation11 + $0x28] sm:$0xff]  ;;  %v653_v50 = vld [vmem:[#allocation11 + $0x20] sm:$0xff] }
  0x22   :  { %282 = vmatpush.bf16.msra.mxu1 %v647_v6  ;;  %397 = vmatpush.bf16.msra.mxu3 %v656_v47  ;;  %v652_v52 = vld [vmem:[#allocation11 + $0x18] sm:$0xff]  ;;  %v651_v56 = vld [vmem:[#allocation11 + $0x10] sm:$0xff]  ;;  %v650_v58 = vld [vmem:[#allocation11 + $0x8] sm:$0xff] }
  0x23   :  { %v679_v55 = vld [vmem:[#allocation3] ss:$0 sm:$0xff]  ;;  %v649_v2 = vld [vmem:[#allocation11] sm:$0xff] }
  0x24   :  { %537 = vmatmul.msk.bf16.vlgmr.msra.gmra.mxu0 %vm154_vm0, %v133_v4  ;;  %v678_v57 = vld [vmem:[%s968_s5] ss:$0 sm:$0xff]  ;;  %vm299_vm9 = vcmp.eq.s32.totalorder %v297_v54, %v679_v55 }
  0x25   :  { %v572_v63 = vsel %vm299_vm9, 1.0, %v881_v62  ;;  %v664_v6 = vld [vmem:[#allocation12 + $0x38] sm:$0xff] }
  0x26   :  { %283 = vmatpush.bf16.msra.mxu1 %v646_v7  ;;  %398 = vmatpush.bf16.msra.mxu3 %v655_v48  ;;  %v302_v1 = vpack.c.bf16 %v572_v63, %v572_v63  ;;  %v663_v7 = vld [vmem:[#allocation12 + $0x30] sm:$0xff] }
  0x27   :  { %495 = vmatpush.bf16.msra.mxu2 %v664_v6 }
  0x2a   :  { %284 = vmatpush.bf16.msra.mxu1 %v645_v8  ;;  %399 = vmatpush.bf16.msra.mxu3 %v654_v49  ;;  %v662_v8 = vld [vmem:[#allocation12 + $0x28] sm:$0xff] }
  0x2b   :  { %496 = vmatpush.bf16.msra.mxu2 %v663_v7 }
  0x2e   :  { %285 = vmatpush.bf16.msra.mxu1 %v644_v9  ;;  %400 = vmatpush.bf16.msra.mxu3 %v653_v50  ;;  %v661_v9 = vld [vmem:[#allocation12 + $0x20] sm:$0xff] }
  0x2f   :  { %497 = vmatpush.bf16.msra.mxu2 %v662_v8 }
  0x32   :  { %286 = vmatpush.bf16.msra.mxu1 %v643_v11  ;;  %401 = vmatpush.bf16.msra.mxu3 %v652_v52  ;;  %v659_v11 = vld [vmem:[#allocation12 + $0x10] sm:$0xff] }
  0x33   :  { %498 = vmatpush.bf16.msra.mxu2 %v661_v9 }
  0x36   :  { %287 = vmatpush.bf16.msra.mxu1 %v642_v14  ;;  %402 = vmatpush.bf16.msra.mxu3 %v651_v56  ;;  %v680_v14 = vld [vmem:[%s970_s7] ss:$0 sm:$0xff]  ;;  %s882_s7 = smov [#allocation14]  }
  0x37   :  { %s514_s20 = sshll.u32 %s882_s7, 4  ;;  %s515_s20 = int_to_ptr.vmem [resolvable:$true] %s514_s20 }
  0x3a   :  { %288 = vmatpush.bf16.msra.mxu1 %v641_v16  ;;  %403 = vmatpush.bf16.msra.mxu3 %v650_v58 }
  0x3e   :  { %404 = vmatpush.bf16.msra.mxu3 %v649_v2 }
  0xa1   :  { %v167_v12 = vpop.f32.mrf.mxu0 }
  0xa2   :  { %v168_v13 = vadd.f32 %v677_v10, %v167_v12  ;;  %v658_v12 = vld [vmem:[#allocation12 + $0x8] sm:$0xff] }
  0xa4   :  { %v538_v15 = vmul.f32 -1.442695, %v168_v13 }
  0xa6   :  { %681 = vpow2.f32 %v538_v15 }
  0xa9   :  { %v169_v17 = vpop.f32.mrf.mxu0 }
  0xaa   :  { %v170_v18 = vadd.f32 %v677_v10, %v169_v17  ;;  %v660_v10 = vld [vmem:[#allocation12 + $0x18] sm:$0xff] }
  0xab   :  { %499 = vmatpush.bf16.msra.mxu2 %v660_v10 }
  0xac   :  { %v682_v19 = vpop.eup %681  ;;  %v539_v20 = vmul.f32 -1.442695, %v170_v18 }
  0xad   :  { %v178_v21 = vadd.f32 1.0, %v682_v19 }
  0xae   :  { %683 = vpow2.f32 %v539_v20 }
  0xaf   :  { %685 = vrcp.f32 %v178_v21  ;;  %v191_v31 = vand.u32 2147483648, %v178_v21  ;;  %vm185_vm2 = vweird.f32 %v178_v21  ;;  %v189_v32 = vand.u32 2147483647, %v178_v21  ;;  %500 = vmatpush.bf16.msra.mxu2 %v659_v11 }
  0xb1   :  { %v192_v38 = vor.u32 1.1754944e-38, %v191_v31  ;;  %vm190_vm5 = vcmp.eq.f32.partialorder %v189_v32, 8.507059e+37 }
  0xb3   :  { %501 = vmatpush.bf16.msra.mxu2 %v658_v12 }
  0xb4   :  { %v684_v22 = vpop.eup %683 }
  0xb5   :  { %v686_v23 = vpop.eup %685  ;;  %v179_v24 = vadd.f32 1.0, %v684_v22 }
  0xb6   :  { %v181_v25 = vmul.f32 %v686_v23, %v178_v21  ;;  %vm186_vm1 = vweird.f32 %v686_v23 }
  0xb7   :  { %687 = vrcp.f32 %v179_v24  ;;  %vm187_vm3 = vmor %vm185_vm2, %vm186_vm1  ;;  %v206_v34 = vand.u32 2147483648, %v179_v24  ;;  %v204_v37 = vand.u32 2147483647, %v179_v24  ;;  %vm200_vm6 = vweird.f32 %v179_v24 }
  0xb8   :  { %v182_v26 = vsub.f32 1.0, %v181_v25 }
  0xb9   :  { %v207_v41 = vor.u32 1.1754944e-38, %v206_v34  ;;  %vm205_vm8 = vcmp.eq.f32.partialorder %v204_v37, 8.507059e+37 }
  0xba   :  { %v183_v27 = vmul.f32 %v686_v23, %v182_v26 }
  0xbc   :  { %v184_v29 = vadd.f32 %v686_v23, %v183_v27 }
  0xbd   :  { %v688_v28 = vpop.eup %687 }
  0xbe   :  { %v196_v30 = vmul.f32 %v688_v28, %v179_v24  ;;  %v188_v35 = vsel %vm187_vm3, %v686_v23, %v184_v29  ;;  %vm201_vm4 = vweird.f32 %v688_v28 }
  0xbf   :  { %v193_v40 = vsel %vm190_vm5, %v192_v38, %v188_v35  ;;  %vm202_vm7 = vmor %vm200_vm6, %vm201_vm4 }
  0xc0   :  { %v197_v33 = vsub.f32 1.0, %v196_v30  ;;  %v210_v44 = vmul.f32 %v193_v40, %v168_v13  ;;  %v657_v13 = vld [vmem:[#allocation12] sm:$0xff] }
  0xc1   :  { %502 = vmatpush.bf16.msra.mxu2 %v657_v13 }
  0xc2   :  { %v198_v36 = vmul.f32 %v688_v28, %v197_v33 }
  0xc4   :  { %v199_v39 = vadd.f32 %v688_v28, %v198_v36 }
  0xc6   :  { %v203_v42 = vsel %vm202_vm7, %v688_v28, %v199_v39 }
  0xc7   :  { %v208_v43 = vsel %vm205_vm8, %v207_v41, %v203_v42 }
  0xc8   :  { %v211_v45 = vmul.f32 %v208_v43, %v170_v18 }
  0xca   :  { %v212_v46 = vpack.c.bf16 %v211_v45, %v210_v44 }
  0xcc   :  { %289 = vmatmul.bf16.vlgmr.msra.gmra.mxu1 %v212_v46 }
 0x149   :  { %v290_v53 = vpop.f32.mrf.mxu1 }
 0x14a   :  { %v291_v60 = vadd.f32 %v678_v57, %v290_v53 }
 0x151   :  { %v292_v59 = vpop.f32.mrf.mxu1 }
 0x152   :  { %v293_v61 = vadd.f32 %v678_v57, %v292_v59 }
 0x154   :  { %v304_v0 = vpack.c.bf16 %v293_v61, %v291_v60 }
 0x156   :  { %316 = vmatpush.bf16.msrb.mxu0 %v304_v0 }
 0x159   :  { %573 = vmatmul.msk.bf16.vlgmr.msrb.gmra.mxu0 %vm305_vm10, %v302_v1 }
 0x1d6   :  { %v318_v3 = vpop.f32.mrf.mxu0 }
 0x1d7   :  { %v328_v4 = vpack.c.bf16 %v318_v3, %v318_v3 }
 0x1d9   :  { %405 = vmatmul.bf16.vlgmr.msra.gmra.mxu3 %v328_v4 }
 0x1de   :  { %v320_v5 = vpop.f32.mrf.mxu0 }
 0x25c   :  { %v406_v15 = vpop.f32.mrf.mxu3 }
 0x25d   :  { %v407_v16 = vadd.f32 %v680_v14, %v406_v15 }
 0x25f   :  { %v606_v17 = vmul.f32 -1.442695, %v407_v16 }
 0x261   :  { %689 = vpow2.f32 %v606_v17 }
 0x264   :  { %v408_v18 = vpop.f32.mrf.mxu3 }
 0x267   :  { %v690_v19 = vpop.eup %689 }
 0x268   :  { %v413_v20 = vadd.f32 1.0, %v690_v19 }
 0x26a   :  { %691 = vrcp.f32 %v413_v20  ;;  %v425_v24 = vand.u32 2147483648, %v413_v20  ;;  %v423_v26 = vand.u32 2147483647, %v413_v20  ;;  %vm419_vm12 = vweird.f32 %v413_v20 }
 0x26c   :  { %v426_v28 = vor.u32 1.1754944e-38, %v425_v24  ;;  %vm424_vm14 = vcmp.eq.f32.partialorder %v423_v26, 8.507059e+37 }
 0x270   :  { %v692_v21 = vpop.eup %691 }
 0x271   :  { %v415_v22 = vmul.f32 %v692_v21, %v413_v20  ;;  %vm420_vm11 = vweird.f32 %v692_v21 }
 0x272   :  { %vm421_vm13 = vmor %vm419_vm12, %vm420_vm11 }
 0x273   :  { %v416_v23 = vsub.f32 1.0, %v415_v22 }
 0x275   :  { %v417_v25 = vmul.f32 %v692_v21, %v416_v23 }
 0x277   :  { %v418_v27 = vadd.f32 %v692_v21, %v417_v25 }
 0x279   :  { %v422_v29 = vsel %vm421_vm13, %v692_v21, %v418_v27 }
 0x27a   :  { %v427_v30 = vsel %vm424_vm14, %v426_v28, %v422_v29 }
 0x27b   :  { %v429_v31 = vmul.f32 %v427_v30, %v407_v16 }
 0x27d   :  { %v430_v32 = vpack.c.bf16 %v429_v31, %v429_v31 }
 0x27f   :  { %503 = vmatmul.bf16.vlgmr.msra.gmra.mxu2 %v430_v32 }
 0x302   :  { %v504_v33 = vpop.f32.mrf.mxu2 }
 0x303   :  { %508 = vst [vmem:[#allocation14] sm:$0xff] %v504_v33 }
 0x304   :  { %519 = dma.vmem_to_hbm [thread:$0]  %s515_s20, 128, %s517_s23, [#allocation5]  }
 0x30a   :  { %v506_v34 = vpop.f32.mrf.mxu2 }
 0x30b   :  { %869 = dma.done.wait [#allocation5], 128  }
 0x30c   :  { %870 = vsyncadd [#allocation5], 4294967168 }
 0x30d   :  { %524 = vsyncpa [#allocation4], 1 }
 0x30e   :  { %525 = vsyncpa [#allocation7], 1 }
 0x30f   :  { %526 = vsyncpa [#allocation10], 1 }
 0x310   :  { %527 = vsyncpa [#allocation13], 1 }
 0x311   :  { %528 = vsyncpa [#allocation5], 1 }

</bundles_post_ra>
